<compile_context>
chip_gen: v6e
topology: v6e:2x2x1
jax: 0.10.0
libtpu: 0.0.40
codegen_flags: <defaults>
</compile_context>

<pallas_src>
import functools

import jax
import jax.numpy as jnp
from jax.experimental import pallas as pl
from jax.experimental.pallas import tpu as pltpu


def _mlp_kernel(x_ref, w1_ref, b1_ref, w2_ref, b2_ref,
                w3_ref, b3_ref, w4_ref, b4_ref, o_ref):
    wdt = w1_ref.dtype  # MXU operand dtype (f32 or bf16); accumulation is f32

    x = x_ref[...].astype(wdt)
    # Layer 1: Linear + ReLU   (dropout1 = identity in eval mode)
    h = jnp.dot(x, w1_ref[...], preferred_element_type=jnp.float32)
    h = jnp.maximum(h + b1_ref[...], 0.0)
    # Layer 2: Linear + ReLU   (dropout2 = identity)
    h = jnp.dot(h.astype(wdt), w2_ref[...], preferred_element_type=jnp.float32)
    h = jnp.maximum(h + b2_ref[...], 0.0)
    # Layer 3: Linear + ReLU   (dropout3 = identity)
    h = jnp.dot(h.astype(wdt), w3_ref[...], preferred_element_type=jnp.float32)
    h = jnp.maximum(h + b3_ref[...], 0.0)
    # Layer 4: Linear + Sigmoid
    logits = jnp.dot(h.astype(wdt), w4_ref[...],
                     preferred_element_type=jnp.float32) + b4_ref[...]
    o_ref[...] = jax.nn.sigmoid(logits).astype(o_ref.dtype)


def _round_up(x, m):
    return (x + m - 1) // m * m


def _reference(x, p):
    h = jax.nn.relu(x @ p["w1"] + p["b1"])
    h = jax.nn.relu(h @ p["w2"] + p["b2"])
    h = jax.nn.relu(h @ p["w3"] + p["b3"])
    return jax.nn.sigmoid(h @ p["w4"] + p["b4"])


@functools.partial(
    jax.jit, static_argnames=("block_b", "compute_dtype", "min_pallas_rows"))
def phenotyper_mlp(x, params, block_b=1024, compute_dtype=jnp.float32,
                   min_pallas_rows=1024):
    """x: (B, nIp).  params: w1..w4 (in,out), b1..b4 (1,out) float32.

    compute_dtype=jnp.bfloat16 is recommended on all TPU generations
    (v5e/v6e/v7x MXUs are bf16-native); f32 accumulation is always used and
    biases / ReLU / sigmoid stay f32.  Batches smaller than `min_pallas_rows`
    take a fused pure-XLA path (pallas_call fixed overhead dominates there).
    """
    B, nIp = x.shape
    nhid = params["w1"].shape[1]
    nOp = params["w4"].shape[1]

    if B < min_pallas_rows:
        # Small-batch fallback: a fused XLA graph matches/beats the kernel.
        return _reference(x, params)

    # Weights in compute dtype (tiny, VMEM-resident); biases stay f32.
    w1 = params["w1"].astype(compute_dtype)
    w2 = params["w2"].astype(compute_dtype)
    w3 = params["w3"].astype(compute_dtype)
    w4 = params["w4"].astype(compute_dtype)
    b1, b2, b3, b4 = params["b1"], params["b2"], params["b3"], params["b4"]

    # Batch tile: fat, but never more than ceil(B/2) (rounded to sublane=8) so
    # the grid has >=2 steps -> both v7x TensorCores get work.
    block_b_eff = max(8, min(block_b, _round_up(pl.cdiv(B, 2), 8)))
    grid = (pl.cdiv(B, block_b_eff),)  # ragged last tile handled by Pallas

    def full_spec(shape):
        # Whole array, constant block index -> resident in VMEM, no re-DMA.
        return pl.BlockSpec(shape, lambda i: (0, 0))

    w_isz = w1.dtype.itemsize
    flops = 2 * B * (nIp * nhid + 2 * nhid * nhid + nhid * nOp)
    bytes_accessed = (B * nIp * x.dtype.itemsize          # x read
                      + B * nOp * 4                        # out write (f32)
                      + (nIp * nhid + 2 * nhid * nhid + nhid * nOp) * w_isz
                      + (3 * nhid + nOp) * 4)              # biases (f32)
    cost = pl.CostEstimate(flops=flops, transcendentals=B * nOp,
                           bytes_accessed=bytes_accessed)

    grid_spec = pltpu.PrefetchScalarGridSpec(
        num_scalar_prefetch=0,
        grid=grid,
        in_specs=[
            # x: full (un-padded) feature width; only the batch axis is tiled.
            pl.BlockSpec((block_b_eff, nIp), lambda i: (i, 0)),
            full_spec(w1.shape), full_spec(b1.shape),
            full_spec(w2.shape), full_spec(b2.shape),
            full_spec(w3.shape), full_spec(b3.shape),
            full_spec(w4.shape), full_spec(b4.shape),
        ],
        # Narrow (nOp-wide) output block: masked vst in VMEM, but ~16x fewer
        # HBM write bytes than a 128-lane-padded f32 output.
        out_specs=pl.BlockSpec((block_b_eff, nOp), lambda i: (i, 0)),
    )

    return pl.pallas_call(
        _mlp_kernel,
        out_shape=jax.ShapeDtypeStruct((B, nOp), jnp.float32),
        grid_spec=grid_spec,
        cost_estimate=cost,
        compiler_params=pltpu.CompilerParams(
            dimension_semantics=("parallel",)),
    )(x, w1, b1, w2, b2, w3, b3, w4, b4)


def init_params(key, nIp, nhid, nOp):
    """Deterministic synthetic init (uniform, torch-Linear-like scaling)."""
    def linear(key, fan_in, fan_out):
        kw, kb = jax.random.split(key)
        bound = 1.0 / jnp.sqrt(fan_in)
        w = jax.random.uniform(kw, (fan_in, fan_out), jnp.float32, -bound, bound)
        b = jax.random.uniform(kb, (1, fan_out), jnp.float32, -bound, bound)
        return w, b

    k1, k2, k3, k4 = jax.random.split(key, 4)
    w1, b1 = linear(k1, nIp, nhid)
    w2, b2 = linear(k2, nhid, nhid)
    w3, b3 = linear(k3, nhid, nhid)
    w4, b4 = linear(k4, nOp and nhid, nOp)
    return dict(w1=w1, b1=b1, w2=w2, b2=b2, w3=w3, b3=b3, w4=w4, b4=b4)


if __name__ == "__main__":
    nIp, nhid, nOp = 16, 32, 8

    key = jax.random.PRNGKey(0)
    kx1, kx2, kp = jax.random.split(key, 3)
    params = init_params(kp, nIp, nhid, nOp)

    # --- Case 1: small ragged batch, force the Pallas path (2 grid steps,
    # ragged last tile exercises padded-read / masked-write handling).
    B1 = 200
    x1 = jax.random.normal(kx1, (B1, nIp), jnp.float32)
    ref1 = _reference(x1, params)
    out1 = jax.block_until_ready(
        phenotyper_mlp(x1, params, min_pallas_rows=0))
    assert out1.shape == (B1, nOp)
    assert jnp.allclose(out1, ref1, atol=1e-5, rtol=1e-5), "f32 ragged mismatch"

    # Default call at small B takes the fused-XLA fallback (exact).
    out1_fb = jax.block_until_ready(phenotyper_mlp(x1, params))
    assert jnp.allclose(out1_fb, ref1, atol=1e-6, rtol=1e-6), "fallback mismatch"

    # --- Case 2: larger batch, natural Pallas path (block_b=1024, grid=2).
    B2 = 2048
    x2 = jax.random.normal(kx2, (B2, nIp), jnp.float32)
    ref2 = _reference(x2, params)
    out2 = jax.block_until_ready(phenotyper_mlp(x2, params))
    assert out2.shape == (B2, nOp)
    assert jnp.allclose(out2, ref2, atol=1e-5, rtol=1e-5), "f32 mismatch"

    # bf16 operand path (recommended on all generations), f32 accumulation.
    out2_bf16 = jax.block_until_ready(
        phenotyper_mlp(x2, params, compute_dtype=jnp.bfloat16))
    assert out2_bf16.shape == (B2, nOp)
    assert jnp.allclose(out2_bf16, ref2, atol=2e-2, rtol=2e-2), "bf16 mismatch"

    print("KERNEL_OK")
</pallas_src>

<mosaic_0001>
module attributes {stable_mosaic.version = 11 : i64} {
  func.func @_mlp_kernel(%arg0: i32, %arg1: memref<104x16xf32, #tpu.memory_space<vmem>>, %arg2: memref<16x32xf32, #tpu.memory_space<vmem>>, %arg3: memref<1x32xf32, #tpu.memory_space<vmem>>, %arg4: memref<32x32xf32, #tpu.memory_space<vmem>>, %arg5: memref<1x32xf32, #tpu.memory_space<vmem>>, %arg6: memref<32x32xf32, #tpu.memory_space<vmem>>, %arg7: memref<1x32xf32, #tpu.memory_space<vmem>>, %arg8: memref<32x8xf32, #tpu.memory_space<vmem>>, %arg9: memref<1x8xf32, #tpu.memory_space<vmem>>, %arg10: memref<104x8xf32, #tpu.memory_space<vmem>>) attributes {dimension_semantics = [#tpu.dimension_semantics<parallel>], iteration_bounds = array<i64: 2>, scalar_prefetch = 0 : i64, scratch_operands = 0 : i64, tpu.core_type = #tpu.core_type<tc>, window_params = [{transform_indices = @transform_0, window_bounds = array<i64: 104, 16>}, {pipeline_mode = #tpu.pipeline_mode<synchronous>, transform_indices = @transform_1, window_bounds = array<i64: 16, 32>}, {pipeline_mode = #tpu.pipeline_mode<synchronous>, transform_indices = @transform_2, window_bounds = array<i64: 1, 32>}, {pipeline_mode = #tpu.pipeline_mode<synchronous>, transform_indices = @transform_3, window_bounds = array<i64: 32, 32>}, {pipeline_mode = #tpu.pipeline_mode<synchronous>, transform_indices = @transform_4, window_bounds = array<i64: 1, 32>}, {pipeline_mode = #tpu.pipeline_mode<synchronous>, transform_indices = @transform_5, window_bounds = array<i64: 32, 32>}, {pipeline_mode = #tpu.pipeline_mode<synchronous>, transform_indices = @transform_6, window_bounds = array<i64: 1, 32>}, {pipeline_mode = #tpu.pipeline_mode<synchronous>, transform_indices = @transform_7, window_bounds = array<i64: 32, 8>}, {pipeline_mode = #tpu.pipeline_mode<synchronous>, transform_indices = @transform_8, window_bounds = array<i64: 1, 8>}, {transform_indices = @transform_9, window_bounds = array<i64: 104, 8>}]} {
    %c0 = arith.constant 0 : index
    %c0_0 = arith.constant 0 : index
    %0 = vector.load %arg1[%c0, %c0_0] : memref<104x16xf32, #tpu.memory_space<vmem>>, vector<104x16xf32>
    %c0_1 = arith.constant 0 : index
    %c0_2 = arith.constant 0 : index
    %1 = vector.load %arg2[%c0_1, %c0_2] : memref<16x32xf32, #tpu.memory_space<vmem>>, vector<16x32xf32>
    %cst = arith.constant dense<0.000000e+00> : vector<104x32xf32>
    %2 = tpu.matmul %0, %1, %cst {dimension_numbers = #tpu.dot_dimension_numbers<[1], [0], [0], [1], [0, 0, 1, 1], [], []>} : vector<104x16xf32>, vector<16x32xf32>, vector<104x32xf32> -> vector<104x32xf32>
    %c0_3 = arith.constant 0 : index
    %c0_4 = arith.constant 0 : index
    %3 = vector.load %arg3[%c0_3, %c0_4] : memref<1x32xf32, #tpu.memory_space<vmem>>, vector<1x32xf32>
    %4 = vector.broadcast %3 : vector<1x32xf32> to vector<104x32xf32>
    %5 = arith.addf %2, %4 : vector<104x32xf32>
    %cst_5 = arith.constant 0.000000e+00 : f32
    %6 = vector.broadcast %cst_5 : f32 to vector<104x32xf32>
    %7 = arith.maximumf %5, %6 : vector<104x32xf32>
    %c0_6 = arith.constant 0 : index
    %c0_7 = arith.constant 0 : index
    %8 = vector.load %arg4[%c0_6, %c0_7] : memref<32x32xf32, #tpu.memory_space<vmem>>, vector<32x32xf32>
    %cst_8 = arith.constant dense<0.000000e+00> : vector<104x32xf32>
    %9 = tpu.matmul %7, %8, %cst_8 {dimension_numbers = #tpu.dot_dimension_numbers<[1], [0], [0], [1], [0, 0, 1, 1], [], []>} : vector<104x32xf32>, vector<32x32xf32>, vector<104x32xf32> -> vector<104x32xf32>
    %c0_9 = arith.constant 0 : index
    %c0_10 = arith.constant 0 : index
    %10 = vector.load %arg5[%c0_9, %c0_10] : memref<1x32xf32, #tpu.memory_space<vmem>>, vector<1x32xf32>
    %11 = vector.broadcast %10 : vector<1x32xf32> to vector<104x32xf32>
    %12 = arith.addf %9, %11 : vector<104x32xf32>
    %cst_11 = arith.constant 0.000000e+00 : f32
    %13 = vector.broadcast %cst_11 : f32 to vector<104x32xf32>
    %14 = arith.maximumf %12, %13 : vector<104x32xf32>
    %c0_12 = arith.constant 0 : index
    %c0_13 = arith.constant 0 : index
    %15 = vector.load %arg6[%c0_12, %c0_13] : memref<32x32xf32, #tpu.memory_space<vmem>>, vector<32x32xf32>
    %cst_14 = arith.constant dense<0.000000e+00> : vector<104x32xf32>
    %16 = tpu.matmul %14, %15, %cst_14 {dimension_numbers = #tpu.dot_dimension_numbers<[1], [0], [0], [1], [0, 0, 1, 1], [], []>} : vector<104x32xf32>, vector<32x32xf32>, vector<104x32xf32> -> vector<104x32xf32>
    %c0_15 = arith.constant 0 : index
    %c0_16 = arith.constant 0 : index
    %17 = vector.load %arg7[%c0_15, %c0_16] : memref<1x32xf32, #tpu.memory_space<vmem>>, vector<1x32xf32>
    %18 = vector.broadcast %17 : vector<1x32xf32> to vector<104x32xf32>
    %19 = arith.addf %16, %18 : vector<104x32xf32>
    %cst_17 = arith.constant 0.000000e+00 : f32
    %20 = vector.broadcast %cst_17 : f32 to vector<104x32xf32>
    %21 = arith.maximumf %19, %20 : vector<104x32xf32>
    %c0_18 = arith.constant 0 : index
    %c0_19 = arith.constant 0 : index
    %22 = vector.load %arg8[%c0_18, %c0_19] : memref<32x8xf32, #tpu.memory_space<vmem>>, vector<32x8xf32>
    %cst_20 = arith.constant dense<0.000000e+00> : vector<104x8xf32>
    %23 = tpu.matmul %21, %22, %cst_20 {dimension_numbers = #tpu.dot_dimension_numbers<[1], [0], [0], [1], [0, 0, 1, 1], [], []>} : vector<104x32xf32>, vector<32x8xf32>, vector<104x8xf32> -> vector<104x8xf32>
    %c0_21 = arith.constant 0 : index
    %c0_22 = arith.constant 0 : index
    %24 = vector.load %arg9[%c0_21, %c0_22] : memref<1x8xf32, #tpu.memory_space<vmem>>, vector<1x8xf32>
    %25 = vector.broadcast %24 : vector<1x8xf32> to vector<104x8xf32>
    %26 = arith.addf %23, %25 : vector<104x8xf32>
    %27 = arith.negf %26 : vector<104x8xf32>
    %28 = math.exp %27 : vector<104x8xf32>
    %cst_23 = arith.constant 1.000000e+00 : f32
    %29 = vector.broadcast %cst_23 : f32 to vector<104x8xf32>
    %30 = arith.addf %29, %28 : vector<104x8xf32>
    %31 = arith.divf %29, %30 : vector<104x8xf32>
    %c0_24 = arith.constant 0 : index
    %c0_25 = arith.constant 0 : index
    %32 = vector.load %arg10[%c0_24, %c0_25] : memref<104x8xf32, #tpu.memory_space<vmem>>, vector<104x8xf32>
    tpu.vector_store %arg10[%c0_24, %c0_25], %31 {strides = array<i32>} : memref<104x8xf32, #tpu.memory_space<vmem>>, vector<104x8xf32>,
    return
  }
  func.func @transform_0(%arg0: i32) -> (i32, i32) {
    %c0_i32 = arith.constant 0 : i32
    %c0_i32_0 = arith.constant 0 : i32
    return %arg0, %c0_i32 : i32, i32
  }
  func.func @transform_1(%arg0: i32) -> (i32, i32) {
    %c0_i32 = arith.constant 0 : i32
    %c0_i32_0 = arith.constant 0 : i32
    %c0_i32_1 = arith.constant 0 : i32
    return %c0_i32, %c0_i32_0 : i32, i32
  }
  func.func @transform_2(%arg0: i32) -> (i32, i32) {
    %c0_i32 = arith.constant 0 : i32
    %c0_i32_0 = arith.constant 0 : i32
    %c0_i32_1 = arith.constant 0 : i32
    return %c0_i32, %c0_i32_0 : i32, i32
  }
  func.func @transform_3(%arg0: i32) -> (i32, i32) {
    %c0_i32 = arith.constant 0 : i32
    %c0_i32_0 = arith.constant 0 : i32
    %c0_i32_1 = arith.constant 0 : i32
    return %c0_i32, %c0_i32_0 : i32, i32
  }
  func.func @transform_4(%arg0: i32) -> (i32, i32) {
    %c0_i32 = arith.constant 0 : i32
    %c0_i32_0 = arith.constant 0 : i32
    %c0_i32_1 = arith.constant 0 : i32
    return %c0_i32, %c0_i32_0 : i32, i32
  }
  func.func @transform_5(%arg0: i32) -> (i32, i32) {
    %c0_i32 = arith.constant 0 : i32
    %c0_i32_0 = arith.constant 0 : i32
    %c0_i32_1 = arith.constant 0 : i32
    return %c0_i32, %c0_i32_0 : i32, i32
  }
  func.func @transform_6(%arg0: i32) -> (i32, i32) {
    %c0_i32 = arith.constant 0 : i32
    %c0_i32_0 = arith.constant 0 : i32
    %c0_i32_1 = arith.constant 0 : i32
    return %c0_i32, %c0_i32_0 : i32, i32
  }
  func.func @transform_7(%arg0: i32) -> (i32, i32) {
    %c0_i32 = arith.constant 0 : i32
    %c0_i32_0 = arith.constant 0 : i32
    %c0_i32_1 = arith.constant 0 : i32
    return %c0_i32, %c0_i32_0 : i32, i32
  }
  func.func @transform_8(%arg0: i32) -> (i32, i32) {
    %c0_i32 = arith.constant 0 : i32
    %c0_i32_0 = arith.constant 0 : i32
    %c0_i32_1 = arith.constant 0 : i32
    return %c0_i32, %c0_i32_0 : i32, i32
  }
  func.func @transform_9(%arg0: i32) -> (i32, i32) {
    %c0_i32 = arith.constant 0 : i32
    %c0_i32_0 = arith.constant 0 : i32
    return %arg0, %c0_i32 : i32, i32
  }
}

</mosaic_0001>

<bundles_post_ra>
// kernel: phenotyper_mlp.1
= control target key start
LH: loop header
LB: loop body
LE: loop exit
PB: predicated region body
PF: predicated region fallthrough
CT: control target
= control target key end

     0   :  { %s2109_s30 = smov 0   ;;  %s2111_s10 = smov 0   ;;  %s2563_s0 = inlined_call_operand.vmem [shape: f32[200,16], index: 0, kind: input, shape index: {}]   ;;  %s2564_s1 = inlined_call_operand.vmem [shape: f32[16,32], index: 1, kind: input, shape index: {}]   ;;  %s2565_s2 = inlined_call_operand.vmem [shape: f32[1,32], index: 2, kind: input, shape index: {}]   ;;  %s2566_s3 = inlined_call_operand.vmem [shape: f32[32,32], index: 3, kind: input, shape index: {}]   ;;  %s2567_s4 = inlined_call_operand.vmem [shape: f32[1,32], index: 4, kind: input, shape index: {}]   ;;  %s2568_s5 = inlined_call_operand.vmem [shape: f32[32,32], index: 5, kind: input, shape index: {}]   ;;  %s2569_s6 = inlined_call_operand.vmem [shape: f32[1,32], index: 6, kind: input, shape index: {}]   ;;  %s2570_s7 = inlined_call_operand.vmem [shape: f32[32,8], index: 7, kind: input, shape index: {}]   ;;  %s2571_s8 = inlined_call_operand.vmem [shape: f32[1,8], index: 8, kind: input, shape index: {}]   ;;  %s2572_s9 = inlined_call_operand.vmem [shape: f32[200,8], index: 9, kind: output, shape index: {}]  }
   0x1   :  { %s2113_s11 = smov 0  }
   0x2 LB: > { %s2122_s12 = sadd.s32 4294967295, %s2023_s11   ;;  %s2124_s13 = sadd.s32 1, %s2023_s11   ;;  %s2023_s11 = sphi %s2113_s11, %s2579_s11   ;;  %s2019_s10 = sphi %s2111_s10, %s2578_s10   ;;  %s2015_s30 = sphi %s2109_s30, %s2577_s30  }
   0x3   : > { %s217_s14 = ssub.s32 %s2023_s11, %s2124_s13  ;;  %s220_s15 = sadd.s32 1, %s2019_s10 }
   0x4   : > { %p218_p0 = scmp.eq.s32.totalorder %s217_s14, 0  ;;  %p230_p1 = scmp.ne.s32.totalorder %s2019_s10, %s2015_s30 }
   0x5   : > { %p231_p2 = scmp.eq.s32.totalorder %s2122_s12, 1  ;;  %p1487_p3 = scmp.ge.s32.totalorder %s2023_s11, 1 }
   0x6   : > { %s2132_s16 = scalar_select %p218_p0, %s2019_s10, %s220_s15  }
   0x7   : > { %p2134_p4 = por %p231_p2, %p230_p1  ;;  %p296_p5 = scmp.lt.s32.totalorder %s2023_s11, 3 }
   0x9   : > { %p297_p6 = pnand %p1487_p3, %p296_p5 }
   0xa   : > { %s2142_s20 = smul.u32 (!%p297_p6), 13, %s2122_s12  ;;  %s332_s15 = sand.u32 (!%p297_p6), 1, %s2015_s30  }
   0xb   : > { %300 = sbr.rel (%p297_p6) target bundleno = 943 (0x3af), region = 56 }
   0xc   : > { %p340_p7 = scmp.lt.s32.totalorder (!%p297_p6), %s2142_s20, 24  ;;  %s1821_s18 = smul.u32 (!%p297_p6), 104, %s332_s15 }
   0xe   : > { %s2442_s30 = scalar_lea.vmem (!%p297_p6), [#allocation2], %s1821_s18  }
  0x10   : > { %v368_v0 = vld [vmem:[%s2564_s1 + $0x8] sm:$0xff]  ;;  %v2057_v1 = vmov 0.0   ;;  %v367_v2 = vld [vmem:[%s2564_s1] sm:$0xff]  ;;  %vm2058_vm0 = vmmov 0   ;;  %v562_v3 = vld [vmem:[%s2566_s3 + $0x18] sm:$0xff]  ;;  %s341_s25 = scalar_select %p340_p7, %s2142_s20, 24 }
  0x11   : > { %1637 = vmatprep.subr.mxu0 %v2057_v1  ;;  %1641 = vmatprep.mubr.msk.f32.mxu0 %vm2058_vm0, %v2057_v1  ;;  %vm376_vm1 = vcmask 130048   ;;  %v561_v17 = vld [vmem:[%s2566_s3 + $0x10] sm:$0xff]  ;;  %v560_v18 = vld [vmem:[%s2566_s3 + $0x8] sm:$0xff]  ;;  %v559_v19 = vld [vmem:[%s2566_s3] sm:$0xff]  ;;  %vm570_vm2 = vcmask 261120   ;;  %vm1204_vm3 = vcmask 64512  }
  0x12   : > { %1638 = vmatpush3.msra.mxu0 %v368_v0  ;;  %1680 = vmatprep.subr.mxu1 %v2057_v1  ;;  %s1488_s26 = sshll.u32 %s341_s25, 3  ;;  %v756_v20 = vld [vmem:[%s2568_s5 + $0x18] sm:$0xff]  ;;  %v755_v21 = vld [vmem:[%s2568_s5 + $0x10] sm:$0xff]  ;;  %v754_v22 = vld [vmem:[%s2568_s5 + $0x8] sm:$0xff]  ;;  %s1226_s19 = ssub.s32 (%p2134_p4), 25, %s2142_s20 }
  0x13   : > { %1639 = vmatprep.subr.mxu0 %v2057_v1  ;;  %1681 = vmatpush3.msra.mxu1 %v562_v3  ;;  %s2164_s29 = scalar_lea.vmem %s2563_s0, %s1488_s26  ;;  %v753_v23 = vld [vmem:[%s2568_s5] sm:$0xff]  ;;  %s1570_s21 = smul.u32 (%p2134_p4), 104, %s2122_s12 }
  0x14   : > { %1640 = vmatpush3.msra.mxu0 %v367_v2  ;;  %1682 = vmatprep.subr.mxu1 %v2057_v1  ;;  %v354_v4 = vld [vmem:[%s2164_s29] sm:$0xff]  ;;  %v355_v5 = vld [vmem:[%s2164_s29 + $0x8] sm:$0xff]  ;;  %v356_v6 = vld [vmem:[%s2164_s29 + $0x10] sm:$0xff]  ;;  %p1227_p8 = scmp.lt.s32.totalorder (%p2134_p4), %s1226_s19, 13 }
  0x15   : > { %1688 = vmatprep.mubr.msk.f32.mxu1 %vm2058_vm0, %v2057_v1  ;;  %1727 = vmatprep.subr.mxu0 %v2057_v1  ;;  %v357_v7 = vld [vmem:[%s2164_s29 + $0x18] sm:$0xff]  ;;  %v358_v8 = vld [vmem:[%s2164_s29 + $0x20] sm:$0xff]  ;;  %v359_v9 = vld [vmem:[%s2164_s29 + $0x28] sm:$0xff]  ;;  %s2481_s24 = scalar_lea.vmem (%p2134_p4), %s2572_s9, %s1570_s21  }
  0x16   : > { %1642 = vmatmul.mubr.msk.f32.vlgmr.msra.gmra.mxu0 %vm376_vm1, %v354_v4  ;;  %v360_v10 = vld [vmem:[%s2164_s29 + $0x30] sm:$0xff]  ;;  %v361_v11 = vld [vmem:[%s2164_s29 + $0x38] sm:$0xff]  ;;  %v362_v12 = vld [vmem:[%s2164_s29 + $0x40] sm:$0xff]  ;;  %1683 = vmatpush3.msra.mxu1 %v561_v17 }
  0x17   : > { %1644 = vmatprep.mubr.msk.f32.mxu0 %vm2058_vm0, %v2057_v1  ;;  %v363_v13 = vld [vmem:[%s2164_s29 + $0x48] sm:$0xff]  ;;  %v364_v14 = vld [vmem:[%s2164_s29 + $0x50] sm:$0xff]  ;;  %v365_v15 = vld [vmem:[%s2164_s29 + $0x58] sm:$0xff]  ;;  %1684 = vmatprep.subr.mxu1 %v2057_v1 }
  0x18   : > { %v366_v16 = vld [vmem:[%s2164_s29 + $0x60] sm:$0xff]  ;;  %1685 = vmatpush3.msra.mxu1 %v560_v18  ;;  %1728 = vmatpush3.msra.mxu0 %v756_v20 }
  0x19   : > { %1686 = vmatprep.subr.mxu1 %v2057_v1  ;;  %1729 = vmatprep.subr.mxu0 %v2057_v1  ;;  %v2248_v24 = vld [vmem:[%s2565_s2] ss:$0 sm:$0xff] }
  0x1a   : > { %1645 = vmatmul.mubr.msk.f32.gmra.mxu0 %vm376_vm1, %v355_v5  ;;  %1687 = vmatpush3.msra.mxu1 %v559_v19  ;;  %v946_v17 = vld [vmem:[%s2570_s7] sm:$0xff] }
  0x1b   : > { %1647 = vmatprep.mubr.msk.f32.mxu0 %vm2058_vm0, %v2057_v1  ;;  %1774 = vmatprep.subr.mxu1 %v2057_v1  ;;  %v2320_v18 = vld [vmem:[%s2567_s4] ss:$0 sm:$0xff] }
  0x1c   : > { %1730 = vmatpush3.msra.mxu0 %v755_v21 }
  0x1d   : > { %1731 = vmatprep.subr.mxu0 %v2057_v1 }
  0x1e   : > { %1648 = vmatmul.mubr.msk.f32.gmra.mxu0 %vm376_vm1, %v356_v6 }
  0x1f   : > { %1650 = vmatprep.mubr.msk.f32.mxu0 %vm2058_vm0, %v2057_v1  ;;  %1732 = vmatpush3.msra.mxu0 %v754_v22 }
  0x20   : > { %1733 = vmatprep.subr.mxu0 %v2057_v1 }
  0x21   : > { %1734 = vmatpush3.msra.mxu0 %v753_v23 }
  0x22   : > { %1651 = vmatmul.mubr.msk.f32.gmra.mxu0 %vm376_vm1, %v357_v7 }
  0x23   : > { %1653 = vmatprep.mubr.msk.f32.mxu0 %vm2058_vm0, %v2057_v1 }
  0x26   : > { %1654 = vmatmul.mubr.msk.f32.gmra.mxu0 %vm376_vm1, %v358_v8 }
  0x27   : > { %1656 = vmatprep.mubr.msk.f32.mxu0 %vm2058_vm0, %v2057_v1 }
  0x2a   : > { %1657 = vmatmul.mubr.msk.f32.gmra.mxu0 %vm376_vm1, %v359_v9 }
  0x2b   : > { %1659 = vmatprep.mubr.msk.f32.mxu0 %vm2058_vm0, %v2057_v1 }
  0x2e   : > { %1660 = vmatmul.mubr.msk.f32.gmra.mxu0 %vm376_vm1, %v360_v10 }
  0x2f   : > { %1662 = vmatprep.mubr.msk.f32.mxu0 %vm2058_vm0, %v2057_v1 }
  0x32   : > { %1663 = vmatmul.mubr.msk.f32.gmra.mxu0 %vm376_vm1, %v361_v11 }
  0x33   : > { %1665 = vmatprep.mubr.msk.f32.mxu0 %vm2058_vm0, %v2057_v1 }
  0x36   : > { %1666 = vmatmul.mubr.msk.f32.gmra.mxu0 %vm376_vm1, %v362_v12 }
  0x37   : > { %1668 = vmatprep.mubr.msk.f32.mxu0 %vm2058_vm0, %v2057_v1 }
  0x3a   : > { %1669 = vmatmul.mubr.msk.f32.gmra.mxu0 %vm376_vm1, %v363_v13 }
  0x3b   : > { %1671 = vmatprep.mubr.msk.f32.mxu0 %vm2058_vm0, %v2057_v1 }
  0x3e   : > { %1672 = vmatmul.mubr.msk.f32.gmra.mxu0 %vm376_vm1, %v364_v14  ;;  %v949_v14 = vld [vmem:[%s2570_s7 + $0x18] sm:$0xff] }
  0x3f   : > { %1674 = vmatprep.mubr.msk.f32.mxu0 %vm2058_vm0, %v2057_v1 }
  0x42   : > { %1675 = vmatmul.mubr.msk.f32.gmra.mxu0 %vm376_vm1, %v365_v15  ;;  %v948_v15 = vld [vmem:[%s2570_s7 + $0x10] sm:$0xff] }
  0x43   : > { %1677 = vmatprep.mubr.msk.f32.mxu0 %vm2058_vm0, %v2057_v1 }
  0x46   : > { %1678 = vmatmul.mubr.msk.f32.gmra.mxu0 %vm376_vm1, %v366_v16  ;;  %v947_v16 = vld [vmem:[%s2570_s7 + $0x8] sm:$0xff] }
  0x47   : > { %1735 = vmatprep.mubr.msk.f32.mxu0 %vm2058_vm0, %v2057_v1 }
  0xd6   : > { %v482_v25 = vpop.f32.mrf.mxu0 }
  0xd7   : > { %v483_v26 = vadd.f32 %v2248_v24, %v482_v25 }
  0xd8   : > { %v1643_v27 = vpop.f32.mrf.mxu0 }
  0xd9   : > { %v546_v28 = vmax.f32 %v483_v26, 0.0 }
  0xda   : > { %v487_v29 = vpop.f32.mrf.mxu0 }
  0xdb   : > { %v488_v30 = vadd.f32 %v2248_v24, %v487_v29  ;;  %1689 = vmatmul.mubr.msk.f32.vlgmr.msra.gmra.mxu1 %vm570_vm2, %v546_v28 }
  0xdc   : > { %v1646_v31 = vpop.f32.mrf.mxu0  ;;  %1691 = vmatprep.mubr.msk.f32.mxu1 %vm2058_vm0, %v2057_v1  ;;  %1775 = vmatpush3.msra.mxu1 %v949_v14 }
  0xdd   : > { %v547_v32 = vmax.f32 %v488_v30, 0.0  ;;  %1776 = vmatprep.subr.mxu1 %v2057_v1 }
  0xde   : > { %v492_v33 = vpop.f32.mrf.mxu0  ;;  %1777 = vmatpush3.msra.mxu1 %v948_v15 }
  0xdf   : > { %v493_v34 = vadd.f32 %v2248_v24, %v492_v33  ;;  %1692 = vmatmul.mubr.msk.f32.gmra.mxu1 %vm570_vm2, %v547_v32  ;;  %1778 = vmatprep.subr.mxu1 %v2057_v1 }
  0xe0   : > { %v1649_v35 = vpop.f32.mrf.mxu0  ;;  %1694 = vmatprep.mubr.msk.f32.mxu1 %vm2058_vm0, %v2057_v1  ;;  %1779 = vmatpush3.msra.mxu1 %v947_v16 }
  0xe1   : > { %v548_v36 = vmax.f32 %v493_v34, 0.0  ;;  %1780 = vmatprep.subr.mxu1 %v2057_v1 }
  0xe2   : > { %v497_v37 = vpop.f32.mrf.mxu0  ;;  %1781 = vmatpush3.msra.mxu1 %v946_v17 }
  0xe3   : > { %v498_v38 = vadd.f32 %v2248_v24, %v497_v37  ;;  %1695 = vmatmul.mubr.msk.f32.gmra.mxu1 %vm570_vm2, %v548_v36 }
  0xe4   : > { %v1652_v39 = vpop.f32.mrf.mxu0  ;;  %1697 = vmatprep.mubr.msk.f32.mxu1 %vm2058_vm0, %v2057_v1 }
  0xe5   : > { %v549_v40 = vmax.f32 %v498_v38, 0.0 }
  0xe6   : > { %v502_v41 = vpop.f32.mrf.mxu0 }
  0xe7   : > { %v503_v42 = vadd.f32 %v2248_v24, %v502_v41  ;;  %1698 = vmatmul.mubr.msk.f32.gmra.mxu1 %vm570_vm2, %v549_v40 }
  0xe8   : > { %v1655_v43 = vpop.f32.mrf.mxu0  ;;  %1700 = vmatprep.mubr.msk.f32.mxu1 %vm2058_vm0, %v2057_v1 }
  0xe9   : > { %v550_v44 = vmax.f32 %v503_v42, 0.0 }
  0xea   : > { %v507_v45 = vpop.f32.mrf.mxu0 }
  0xeb   : > { %v508_v46 = vadd.f32 %v2248_v24, %v507_v45  ;;  %1701 = vmatmul.mubr.msk.f32.gmra.mxu1 %vm570_vm2, %v550_v44 }
  0xec   : > { %v1658_v47 = vpop.f32.mrf.mxu0  ;;  %1703 = vmatprep.mubr.msk.f32.mxu1 %vm2058_vm0, %v2057_v1 }
  0xed   : > { %v551_v48 = vmax.f32 %v508_v46, 0.0 }
  0xee   : > { %v512_v49 = vpop.f32.mrf.mxu0 }
  0xef   : > { %v513_v50 = vadd.f32 %v2248_v24, %v512_v49  ;;  %1704 = vmatmul.mubr.msk.f32.gmra.mxu1 %vm570_vm2, %v551_v48 }
  0xf0   : > { %v1661_v51 = vpop.f32.mrf.mxu0  ;;  %1706 = vmatprep.mubr.msk.f32.mxu1 %vm2058_vm0, %v2057_v1 }
  0xf1   : > { %v552_v52 = vmax.f32 %v513_v50, 0.0 }
  0xf2   : > { %v517_v53 = vpop.f32.mrf.mxu0 }
  0xf3   : > { %v518_v54 = vadd.f32 %v2248_v24, %v517_v53  ;;  %1707 = vmatmul.mubr.msk.f32.gmra.mxu1 %vm570_vm2, %v552_v52 }
  0xf4   : > { %v1664_v55 = vpop.f32.mrf.mxu0  ;;  %1709 = vmatprep.mubr.msk.f32.mxu1 %vm2058_vm0, %v2057_v1 }
  0xf5   : > { %v553_v56 = vmax.f32 %v518_v54, 0.0 }
  0xf6   : > { %v522_v57 = vpop.f32.mrf.mxu0 }
  0xf7   : > { %v523_v58 = vadd.f32 %v2248_v24, %v522_v57  ;;  %1710 = vmatmul.mubr.msk.f32.gmra.mxu1 %vm570_vm2, %v553_v56 }
  0xf8   : > { %v1667_v59 = vpop.f32.mrf.mxu0  ;;  %1712 = vmatprep.mubr.msk.f32.mxu1 %vm2058_vm0, %v2057_v1 }
  0xf9   : > { %v554_v60 = vmax.f32 %v523_v58, 0.0 }
  0xfa   : > { %v527_v61 = vpop.f32.mrf.mxu0 }
  0xfb   : > { %v528_v62 = vadd.f32 %v2248_v24, %v527_v61  ;;  %1713 = vmatmul.mubr.msk.f32.gmra.mxu1 %vm570_vm2, %v554_v60 }
  0xfc   : > { %v1670_v63 = vpop.f32.mrf.mxu0  ;;  %1715 = vmatprep.mubr.msk.f32.mxu1 %vm2058_vm0, %v2057_v1 }
  0xfd   : > { %v555_v0 = vmax.f32 %v528_v62, 0.0 }
  0xfe   : > { %v532_v2 = vpop.f32.mrf.mxu0 }
  0xff   : > { %v533_v3 = vadd.f32 %v2248_v24, %v532_v2  ;;  %1716 = vmatmul.mubr.msk.f32.gmra.mxu1 %vm570_vm2, %v555_v0 }
 0x100   : > { %v1673_v4 = vpop.f32.mrf.mxu0  ;;  %1718 = vmatprep.mubr.msk.f32.mxu1 %vm2058_vm0, %v2057_v1 }
 0x101   : > { %v556_v5 = vmax.f32 %v533_v3, 0.0 }
 0x102   : > { %v537_v6 = vpop.f32.mrf.mxu0 }
 0x103   : > { %v538_v7 = vadd.f32 %v2248_v24, %v537_v6  ;;  %1719 = vmatmul.mubr.msk.f32.gmra.mxu1 %vm570_vm2, %v556_v5 }
 0x104   : > { %v1676_v8 = vpop.f32.mrf.mxu0  ;;  %1721 = vmatprep.mubr.msk.f32.mxu1 %vm2058_vm0, %v2057_v1 }
 0x105   : > { %v557_v9 = vmax.f32 %v538_v7, 0.0  ;;  %v2375_v8 = vld [vmem:[%s2569_s6] ss:$0 sm:$0xff] }
 0x106   : > { %v542_v10 = vpop.f32.mrf.mxu0 }
 0x107   : > { %v543_v11 = vadd.f32 %v2248_v24, %v542_v10  ;;  %1722 = vmatmul.mubr.msk.f32.gmra.mxu1 %vm570_vm2, %v557_v9 }
 0x108   : > { %v1679_v12 = vpop.f32.mrf.mxu0  ;;  %1724 = vmatprep.mubr.msk.f32.mxu1 %vm2058_vm0, %v2057_v1 }
 0x109   : > { %v558_v13 = vmax.f32 %v543_v11, 0.0 }
 0x10b   : > { %1725 = vmatmul.mubr.msk.f32.gmra.mxu1 %vm570_vm2, %v558_v13 }
 0x10c   : > { %1782 = vmatprep.mubr.msk.f32.mxu1 %vm2058_vm0, %v2057_v1 }
 0x19b   : > { %v676_v19 = vpop.f32.mrf.mxu1 }
 0x19c   : > { %v677_v20 = vadd.f32 %v2320_v18, %v676_v19 }
 0x19d   : > { %v1690_v21 = vpop.f32.mrf.mxu1 }
 0x19e   : > { %v740_v22 = vmax.f32 %v677_v20, 0.0 }
 0x19f   : > { %v681_v23 = vpop.f32.mrf.mxu1 }
 0x1a0   : > { %v682_v24 = vadd.f32 %v2320_v18, %v681_v23  ;;  %1736 = vmatmul.mubr.msk.f32.vlgmr.msra.gmra.mxu0 %vm570_vm2, %v740_v22 }
 0x1a1   : > { %v1693_v25 = vpop.f32.mrf.mxu1  ;;  %1738 = vmatprep.mubr.msk.f32.mxu0 %vm2058_vm0, %v2057_v1 }
 0x1a2   : > { %v741_v26 = vmax.f32 %v682_v24, 0.0 }
 0x1a3   : > { %v686_v27 = vpop.f32.mrf.mxu1 }
 0x1a4   : > { %v687_v28 = vadd.f32 %v2320_v18, %v686_v27  ;;  %1739 = vmatmul.mubr.msk.f32.gmra.mxu0 %vm570_vm2, %v741_v26 }
 0x1a5   : > { %v1696_v29 = vpop.f32.mrf.mxu1  ;;  %1741 = vmatprep.mubr.msk.f32.mxu0 %vm2058_vm0, %v2057_v1 }
 0x1a6   : > { %v742_v30 = vmax.f32 %v687_v28, 0.0 }
 0x1a7   : > { %v691_v31 = vpop.f32.mrf.mxu1 }
 0x1a8   : > { %v692_v32 = vadd.f32 %v2320_v18, %v691_v31  ;;  %1742 = vmatmul.mubr.msk.f32.gmra.mxu0 %vm570_vm2, %v742_v30 }
 0x1a9   : > { %v1699_v33 = vpop.f32.mrf.mxu1  ;;  %1744 = vmatprep.mubr.msk.f32.mxu0 %vm2058_vm0, %v2057_v1 }
 0x1aa   : > { %v743_v34 = vmax.f32 %v692_v32, 0.0 }
 0x1ab   : > { %v696_v35 = vpop.f32.mrf.mxu1 }
 0x1ac   : > { %v697_v36 = vadd.f32 %v2320_v18, %v696_v35  ;;  %1745 = vmatmul.mubr.msk.f32.gmra.mxu0 %vm570_vm2, %v743_v34 }
 0x1ad   : > { %v1702_v37 = vpop.f32.mrf.mxu1  ;;  %1747 = vmatprep.mubr.msk.f32.mxu0 %vm2058_vm0, %v2057_v1 }
 0x1ae   : > { %v744_v38 = vmax.f32 %v697_v36, 0.0 }
 0x1af   : > { %v701_v39 = vpop.f32.mrf.mxu1 }
 0x1b0   : > { %v702_v40 = vadd.f32 %v2320_v18, %v701_v39  ;;  %1748 = vmatmul.mubr.msk.f32.gmra.mxu0 %vm570_vm2, %v744_v38 }
 0x1b1   : > { %v1705_v41 = vpop.f32.mrf.mxu1  ;;  %1750 = vmatprep.mubr.msk.f32.mxu0 %vm2058_vm0, %v2057_v1 }
 0x1b2   : > { %v745_v42 = vmax.f32 %v702_v40, 0.0 }
 0x1b3   : > { %v706_v43 = vpop.f32.mrf.mxu1 }
 0x1b4   : > { %v707_v44 = vadd.f32 %v2320_v18, %v706_v43  ;;  %1751 = vmatmul.mubr.msk.f32.gmra.mxu0 %vm570_vm2, %v745_v42 }
 0x1b5   : > { %v1708_v45 = vpop.f32.mrf.mxu1  ;;  %1753 = vmatprep.mubr.msk.f32.mxu0 %vm2058_vm0, %v2057_v1 }
 0x1b6   : > { %v746_v46 = vmax.f32 %v707_v44, 0.0 }
 0x1b7   : > { %v711_v47 = vpop.f32.mrf.mxu1 }
 0x1b8   : > { %v712_v48 = vadd.f32 %v2320_v18, %v711_v47  ;;  %1754 = vmatmul.mubr.msk.f32.gmra.mxu0 %vm570_vm2, %v746_v46 }
 0x1b9   : > { %v1711_v49 = vpop.f32.mrf.mxu1  ;;  %1756 = vmatprep.mubr.msk.f32.mxu0 %vm2058_vm0, %v2057_v1 }
 0x1ba   : > { %v747_v50 = vmax.f32 %v712_v48, 0.0 }
 0x1bb   : > { %v716_v51 = vpop.f32.mrf.mxu1 }
 0x1bc   : > { %v717_v52 = vadd.f32 %v2320_v18, %v716_v51  ;;  %1757 = vmatmul.mubr.msk.f32.gmra.mxu0 %vm570_vm2, %v747_v50 }
 0x1bd   : > { %v1714_v53 = vpop.f32.mrf.mxu1  ;;  %1759 = vmatprep.mubr.msk.f32.mxu0 %vm2058_vm0, %v2057_v1 }
 0x1be   : > { %v748_v54 = vmax.f32 %v717_v52, 0.0 }
 0x1bf   : > { %v721_v55 = vpop.f32.mrf.mxu1 }
 0x1c0   : > { %v722_v56 = vadd.f32 %v2320_v18, %v721_v55  ;;  %1760 = vmatmul.mubr.msk.f32.gmra.mxu0 %vm570_vm2, %v748_v54 }
 0x1c1   : > { %v1717_v57 = vpop.f32.mrf.mxu1  ;;  %1762 = vmatprep.mubr.msk.f32.mxu0 %vm2058_vm0, %v2057_v1 }
 0x1c2   : > { %v749_v58 = vmax.f32 %v722_v56, 0.0 }
 0x1c3   : > { %v726_v59 = vpop.f32.mrf.mxu1 }
 0x1c4   : > { %v727_v60 = vadd.f32 %v2320_v18, %v726_v59  ;;  %1763 = vmatmul.mubr.msk.f32.gmra.mxu0 %vm570_vm2, %v749_v58 }
 0x1c5   : > { %v1720_v61 = vpop.f32.mrf.mxu1  ;;  %1765 = vmatprep.mubr.msk.f32.mxu0 %vm2058_vm0, %v2057_v1 }
 0x1c6   : > { %v750_v62 = vmax.f32 %v727_v60, 0.0  ;;  %v2430_v61 = vld [vmem:[%s2571_s8] ss:$0 sm:$0xff] }
 0x1c7   : > { %v731_v63 = vpop.f32.mrf.mxu1 }
 0x1c8   : > { %v732_v0 = vadd.f32 %v2320_v18, %v731_v63  ;;  %1766 = vmatmul.mubr.msk.f32.gmra.mxu0 %vm570_vm2, %v750_v62 }
 0x1c9   : > { %v1723_v2 = vpop.f32.mrf.mxu1  ;;  %1768 = vmatprep.mubr.msk.f32.mxu0 %vm2058_vm0, %v2057_v1 }
 0x1ca   : > { %v751_v3 = vmax.f32 %v732_v0, 0.0 }
 0x1cb   : > { %v736_v4 = vpop.f32.mrf.mxu1 }
 0x1cc   : > { %v737_v5 = vadd.f32 %v2320_v18, %v736_v4  ;;  %1769 = vmatmul.mubr.msk.f32.gmra.mxu0 %vm570_vm2, %v751_v3 }
 0x1cd   : > { %v1726_v6 = vpop.f32.mrf.mxu1  ;;  %1771 = vmatprep.mubr.msk.f32.mxu0 %vm2058_vm0, %v2057_v1 }
 0x1ce   : > { %v752_v7 = vmax.f32 %v737_v5, 0.0 }
 0x1d0   : > { %1772 = vmatmul.mubr.msk.f32.gmra.mxu0 %vm570_vm2, %v752_v7 }
 0x260   : > { %v869_v9 = vpop.f32.mrf.mxu0 }
 0x261   : > { %v870_v10 = vadd.f32 %v2375_v8, %v869_v9 }
 0x262   : > { %v1737_v11 = vpop.f32.mrf.mxu0 }
 0x263   : > { %v933_v12 = vmax.f32 %v870_v10, 0.0 }
 0x264   : > { %v874_v13 = vpop.f32.mrf.mxu0 }
 0x265   : > { %v875_v14 = vadd.f32 %v2375_v8, %v874_v13  ;;  %1783 = vmatmul.mubr.msk.f32.vlgmr.msra.gmra.mxu1 %vm570_vm2, %v933_v12 }
 0x266   : > { %v1740_v15 = vpop.f32.mrf.mxu0  ;;  %1785 = vmatprep.mubr.msk.f32.mxu1 %vm2058_vm0, %v2057_v1 }
 0x267   : > { %v934_v16 = vmax.f32 %v875_v14, 0.0 }
 0x268   : > { %v879_v17 = vpop.f32.mrf.mxu0 }
 0x269   : > { %v880_v18 = vadd.f32 %v2375_v8, %v879_v17  ;;  %1786 = vmatmul.mubr.msk.f32.gmra.mxu1 %vm570_vm2, %v934_v16 }
 0x26a   : > { %v1743_v19 = vpop.f32.mrf.mxu0  ;;  %1788 = vmatprep.mubr.msk.f32.mxu1 %vm2058_vm0, %v2057_v1 }
 0x26b   : > { %v935_v20 = vmax.f32 %v880_v18, 0.0 }
 0x26c   : > { %v884_v21 = vpop.f32.mrf.mxu0 }
 0x26d   : > { %v885_v22 = vadd.f32 %v2375_v8, %v884_v21  ;;  %1789 = vmatmul.mubr.msk.f32.gmra.mxu1 %vm570_vm2, %v935_v20 }
 0x26e   : > { %v1746_v23 = vpop.f32.mrf.mxu0  ;;  %1791 = vmatprep.mubr.msk.f32.mxu1 %vm2058_vm0, %v2057_v1 }
 0x26f   : > { %v936_v24 = vmax.f32 %v885_v22, 0.0 }
 0x270   : > { %v889_v25 = vpop.f32.mrf.mxu0 }
 0x271   : > { %v890_v26 = vadd.f32 %v2375_v8, %v889_v25  ;;  %1792 = vmatmul.mubr.msk.f32.gmra.mxu1 %vm570_vm2, %v936_v24 }
 0x272   : > { %v1749_v27 = vpop.f32.mrf.mxu0  ;;  %1794 = vmatprep.mubr.msk.f32.mxu1 %vm2058_vm0, %v2057_v1 }
 0x273   : > { %v937_v28 = vmax.f32 %v890_v26, 0.0 }
 0x274   : > { %v894_v29 = vpop.f32.mrf.mxu0 }
 0x275   : > { %v895_v30 = vadd.f32 %v2375_v8, %v894_v29  ;;  %1795 = vmatmul.mubr.msk.f32.gmra.mxu1 %vm570_vm2, %v937_v28 }
 0x276   : > { %v1752_v31 = vpop.f32.mrf.mxu0  ;;  %1797 = vmatprep.mubr.msk.f32.mxu1 %vm2058_vm0, %v2057_v1 }
 0x277   : > { %v938_v32 = vmax.f32 %v895_v30, 0.0 }
 0x278   : > { %v899_v33 = vpop.f32.mrf.mxu0 }
 0x279   : > { %v900_v34 = vadd.f32 %v2375_v8, %v899_v33  ;;  %1798 = vmatmul.mubr.msk.f32.gmra.mxu1 %vm570_vm2, %v938_v32 }
 0x27a   : > { %v1755_v35 = vpop.f32.mrf.mxu0  ;;  %1800 = vmatprep.mubr.msk.f32.mxu1 %vm2058_vm0, %v2057_v1 }
 0x27b   : > { %v939_v36 = vmax.f32 %v900_v34, 0.0 }
 0x27c   : > { %v904_v37 = vpop.f32.mrf.mxu0 }
 0x27d   : > { %v905_v38 = vadd.f32 %v2375_v8, %v904_v37  ;;  %1801 = vmatmul.mubr.msk.f32.gmra.mxu1 %vm570_vm2, %v939_v36 }
 0x27e   : > { %v1758_v39 = vpop.f32.mrf.mxu0  ;;  %1803 = vmatprep.mubr.msk.f32.mxu1 %vm2058_vm0, %v2057_v1 }
 0x27f   : > { %v940_v40 = vmax.f32 %v905_v38, 0.0 }
 0x280   : > { %v909_v41 = vpop.f32.mrf.mxu0 }
 0x281   : > { %v910_v42 = vadd.f32 %v2375_v8, %v909_v41  ;;  %1804 = vmatmul.mubr.msk.f32.gmra.mxu1 %vm570_vm2, %v940_v40 }
 0x282   : > { %v1761_v43 = vpop.f32.mrf.mxu0  ;;  %1806 = vmatprep.mubr.msk.f32.mxu1 %vm2058_vm0, %v2057_v1 }
 0x283   : > { %v941_v44 = vmax.f32 %v910_v42, 0.0 }
 0x284   : > { %v914_v45 = vpop.f32.mrf.mxu0 }
 0x285   : > { %v915_v46 = vadd.f32 %v2375_v8, %v914_v45  ;;  %1807 = vmatmul.mubr.msk.f32.gmra.mxu1 %vm570_vm2, %v941_v44 }
 0x286   : > { %v1764_v47 = vpop.f32.mrf.mxu0  ;;  %1809 = vmatprep.mubr.msk.f32.mxu1 %vm2058_vm0, %v2057_v1 }
 0x287   : > { %v942_v48 = vmax.f32 %v915_v46, 0.0 }
 0x288   : > { %v919_v49 = vpop.f32.mrf.mxu0 }
 0x289   : > { %v920_v50 = vadd.f32 %v2375_v8, %v919_v49  ;;  %1810 = vmatmul.mubr.msk.f32.gmra.mxu1 %vm570_vm2, %v942_v48 }
 0x28a   : > { %v1767_v51 = vpop.f32.mrf.mxu0  ;;  %1812 = vmatprep.mubr.msk.f32.mxu1 %vm2058_vm0, %v2057_v1 }
 0x28b   : > { %v943_v52 = vmax.f32 %v920_v50, 0.0 }
 0x28c   : > { %v924_v53 = vpop.f32.mrf.mxu0 }
 0x28d   : > { %v925_v54 = vadd.f32 %v2375_v8, %v924_v53  ;;  %1813 = vmatmul.mubr.msk.f32.gmra.mxu1 %vm570_vm2, %v943_v52 }
 0x28e   : > { %v1770_v55 = vpop.f32.mrf.mxu0  ;;  %1815 = vmatprep.mubr.msk.f32.mxu1 %vm2058_vm0, %v2057_v1 }
 0x28f   : > { %v944_v56 = vmax.f32 %v925_v54, 0.0 }
 0x290   : > { %v929_v57 = vpop.f32.mrf.mxu0 }
 0x291   : > { %v930_v58 = vadd.f32 %v2375_v8, %v929_v57  ;;  %1816 = vmatmul.mubr.msk.f32.gmra.mxu1 %vm570_vm2, %v944_v56 }
 0x292   : > { %v1773_v59 = vpop.f32.mrf.mxu0  ;;  %1818 = vmatprep.mubr.msk.f32.mxu1 %vm2058_vm0, %v2057_v1 }
 0x293   : > { %v945_v60 = vmax.f32 %v930_v58, 0.0 }
 0x295   : > { %1819 = vmatmul.mubr.msk.f32.gmra.mxu1 %vm570_vm2, %v945_v60 }
 0x325   : > { %v1062_v62 = vpop.f32.mrf.mxu1 }
 0x326   : > { %v1063_v63 = vadd.f32 %v2430_v61, %v1062_v62 }
 0x327   : > { %v1784_v0 = vpop.f32.mrf.mxu1 }
 0x328   : > { %v1545_v2 = vmul.f32 -1.442695, %v1063_v63 }
 0x329   : > { %v1067_v3 = vpop.f32.mrf.mxu1 }
 0x32a   : > { %1913 = vpow2.f32 %v1545_v2  ;;  %v1068_v4 = vadd.f32 %v2430_v61, %v1067_v3 }
 0x32b   : > { %v1787_v5 = vpop.f32.mrf.mxu1 }
 0x32c   : > { %v1546_v6 = vmul.f32 -1.442695, %v1068_v4 }
 0x32d   : > { %v1072_v1 = vpop.f32.mrf.mxu1 }
 0x32e   : > { %1915 = vpow2.f32 %v1546_v6  ;;  %v1073_v7 = vadd.f32 %v2430_v61, %v1072_v1 }
 0x32f   : > { %v1790_v8 = vpop.f32.mrf.mxu1 }
 0x330   : > { %v1547_v9 = vmul.f32 -1.442695, %v1073_v7 }
 0x331   : > { %v1077_v10 = vpop.f32.mrf.mxu1 }
 0x332   : > { %1917 = vpow2.f32 %v1547_v9  ;;  %v1078_v11 = vadd.f32 %v2430_v61, %v1077_v10 }
 0x333   : > { %v1793_v12 = vpop.f32.mrf.mxu1 }
 0x334   : > { %v1548_v13 = vmul.f32 -1.442695, %v1078_v11 }
 0x335   : > { %v1082_v14 = vpop.f32.mrf.mxu1 }
 0x336   : > { %1919 = vpow2.f32 %v1548_v13  ;;  %v1083_v15 = vadd.f32 %v2430_v61, %v1082_v14 }
 0x337   : > { %v1914_v16 = vpop.eup %1913  ;;  %v1796_v17 = vpop.f32.mrf.mxu1 }
 0x338   : > { %v1165_v18 = vadd.f32 1.0, %v1914_v16  ;;  %v1549_v19 = vmul.f32 -1.442695, %v1083_v15 }
 0x339   : > { %v1087_v20 = vpop.f32.mrf.mxu1 }
 0x33a   : > { %1921 = vrcp.f32 %v1165_v18  ;;  %v1088_v21 = vadd.f32 %v2430_v61, %v1087_v20 }
 0x33b   : > { %v1916_v22 = vpop.eup %1915  ;;  %1923 = vpow2.f32 %v1549_v19  ;;  %v1799_v23 = vpop.f32.mrf.mxu1 }
 0x33c   : > { %v1166_v24 = vadd.f32 1.0, %v1916_v22  ;;  %v1550_v25 = vmul.f32 -1.442695, %v1088_v21 }
 0x33d   : > { %v1092_v26 = vpop.f32.mrf.mxu1 }
 0x33e   : > { %1925 = vrcp.f32 %v1166_v24  ;;  %v1093_v27 = vadd.f32 %v2430_v61, %v1092_v26 }
 0x33f   : > { %v1918_v28 = vpop.eup %1917  ;;  %1927 = vpow2.f32 %v1550_v25  ;;  %v1802_v29 = vpop.f32.mrf.mxu1 }
 0x340   : > { %v1167_v30 = vadd.f32 1.0, %v1918_v28  ;;  %v1551_v31 = vmul.f32 -1.442695, %v1093_v27 }
 0x341   : > { %v1097_v32 = vpop.f32.mrf.mxu1 }
 0x342   : > { %1929 = vrcp.f32 %v1167_v30  ;;  %v1098_v33 = vadd.f32 %v2430_v61, %v1097_v32 }
 0x343   : > { %v1920_v34 = vpop.eup %1919  ;;  %1931 = vpow2.f32 %v1551_v31  ;;  %v1805_v35 = vpop.f32.mrf.mxu1 }
 0x344   : > { %v1168_v36 = vadd.f32 1.0, %v1920_v34  ;;  %v1552_v37 = vmul.f32 -1.442695, %v1098_v33 }
 0x345   : > { %v1102_v38 = vpop.f32.mrf.mxu1 }
 0x346   : > { %1933 = vrcp.f32 %v1168_v36  ;;  %v1103_v39 = vadd.f32 %v2430_v61, %v1102_v38 }
 0x347   : > { %v1922_v40 = vpop.eup %1921  ;;  %1935 = vpow2.f32 %v1552_v37  ;;  %v1808_v41 = vpop.f32.mrf.mxu1 }
 0x348   : > { %v1924_v42 = vpop.eup %1923  ;;  %1205 = vst.msk [vmem:[%s2442_s30] sm:$0xff] %vm1204_vm3, %v1922_v40  ;;  %v1553_v43 = vmul.f32 -1.442695, %v1103_v39 }
 0x349   : > { %v1169_v44 = vadd.f32 1.0, %v1924_v42  ;;  %v1107_v45 = vpop.f32.mrf.mxu1 }
 0x34a   : > { %1937 = vpow2.f32 %v1553_v43  ;;  %v1108_v46 = vadd.f32 %v2430_v61, %v1107_v45 }
 0x34b   : > { %v1926_v47 = vpop.eup %1925  ;;  %1939 = vrcp.f32 %v1169_v44  ;;  %v1811_v48 = vpop.f32.mrf.mxu1 }
 0x34c   : > { %v1928_v49 = vpop.eup %1927  ;;  %1206 = vst.msk [vmem:[%s2442_s30 + $0x8] sm:$0xff] %vm1204_vm3, %v1926_v47  ;;  %v1554_v50 = vmul.f32 -1.442695, %v1108_v46 }
 0x34d   : > { %v1170_v51 = vadd.f32 1.0, %v1928_v49  ;;  %v1112_v52 = vpop.f32.mrf.mxu1 }
 0x34e   : > { %1941 = vpow2.f32 %v1554_v50  ;;  %v1113_v53 = vadd.f32 %v2430_v61, %v1112_v52 }
 0x34f   : > { %v1930_v54 = vpop.eup %1929  ;;  %1943 = vrcp.f32 %v1170_v51  ;;  %v1814_v55 = vpop.f32.mrf.mxu1 }
 0x350   : > { %v1932_v56 = vpop.eup %1931  ;;  %1207 = vst.msk [vmem:[%s2442_s30 + $0x10] sm:$0xff] %vm1204_vm3, %v1930_v54  ;;  %v1555_v57 = vmul.f32 -1.442695, %v1113_v53 }
 0x351   : > { %v1171_v58 = vadd.f32 1.0, %v1932_v56  ;;  %v1117_v59 = vpop.f32.mrf.mxu1 }
 0x352   : > { %1945 = vpow2.f32 %v1555_v57  ;;  %v1118_v60 = vadd.f32 %v2430_v61, %v1117_v59 }
 0x353   : > { %v1934_v62 = vpop.eup %1933  ;;  %1947 = vrcp.f32 %v1171_v58  ;;  %v1817_v63 = vpop.f32.mrf.mxu1 }
 0x354   : > { %v1936_v0 = vpop.eup %1935  ;;  %1208 = vst.msk [vmem:[%s2442_s30 + $0x18] sm:$0xff] %vm1204_vm3, %v1934_v62  ;;  %v1556_v2 = vmul.f32 -1.442695, %v1118_v60 }
 0x355   : > { %v1172_v3 = vadd.f32 1.0, %v1936_v0  ;;  %v1122_v4 = vpop.f32.mrf.mxu1 }
 0x356   : > { %1949 = vpow2.f32 %v1556_v2  ;;  %v1123_v5 = vadd.f32 %v2430_v61, %v1122_v4 }
 0x357   : > { %v1938_v6 = vpop.eup %1937  ;;  %1951 = vrcp.f32 %v1172_v3  ;;  %v1820_v1 = vpop.f32.mrf.mxu1 }
 0x358   : > { %v1940_v7 = vpop.eup %1939  ;;  %v1173_v8 = vadd.f32 1.0, %v1938_v6  ;;  %v1557_v9 = vmul.f32 -1.442695, %v1123_v5 }
 0x359   : > { %1209 = vst.msk [vmem:[%s2442_s30 + $0x20] sm:$0xff] %vm1204_vm3, %v1940_v7 }
 0x35a   : > { %1953 = vrcp.f32 %v1173_v8 }
 0x35b   : > { %v1942_v10 = vpop.eup %1941  ;;  %1955 = vpow2.f32 %v1557_v9 }
 0x35c   : > { %v1944_v11 = vpop.eup %1943  ;;  %v1174_v12 = vadd.f32 1.0, %v1942_v10 }
 0x35d   : > { %1210 = vst.msk [vmem:[%s2442_s30 + $0x28] sm:$0xff] %vm1204_vm3, %v1944_v11 }
 0x35e   : > { %1957 = vrcp.f32 %v1174_v12 }
 0x35f   : > { %v1946_v61 = vpop.eup %1945 }
 0x360   : > { %v1948_v13 = vpop.eup %1947  ;;  %v1175_v14 = vadd.f32 1.0, %v1946_v61 }
 0x361   : > { %1211 = vst.msk [vmem:[%s2442_s30 + $0x30] sm:$0xff] %vm1204_vm3, %v1948_v13 }
 0x362   : > { %1959 = vrcp.f32 %v1175_v14 }
 0x363   : > { %v1950_v15 = vpop.eup %1949 }
 0x364   : > { %v1952_v16 = vpop.eup %1951  ;;  %v1176_v17 = vadd.f32 1.0, %v1950_v15 }
 0x365   : > { %1212 = vst.msk [vmem:[%s2442_s30 + $0x38] sm:$0xff] %vm1204_vm3, %v1952_v16 }
 0x366   : > { %1961 = vrcp.f32 %v1176_v17 }
 0x367   : > { %v1954_v18 = vpop.eup %1953 }
 0x368   : > { %v1956_v19 = vpop.eup %1955  ;;  %1213 = vst.msk [vmem:[%s2442_s30 + $0x40] sm:$0xff] %vm1204_vm3, %v1954_v18 }
 0x369   : > { %v1177_v20 = vadd.f32 1.0, %v1956_v19 }
 0x36b   : > { %v1958_v21 = vpop.eup %1957  ;;  %1963 = vrcp.f32 %v1177_v20 }
 0x36c   : > { %1214 = vst.msk [vmem:[%s2442_s30 + $0x48] sm:$0xff] %vm1204_vm3, %v1958_v21 }
 0x36f   : > { %v1960_v22 = vpop.eup %1959 }
 0x370   : > { %1215 = vst.msk [vmem:[%s2442_s30 + $0x50] sm:$0xff] %vm1204_vm3, %v1960_v22 }
 0x373   : > { %v1962_v23 = vpop.eup %1961 }
 0x374   : > { %1216 = vst.msk [vmem:[%s2442_s30 + $0x58] sm:$0xff] %vm1204_vm3, %v1962_v23 }
 0x375   : > { %1224 = sbr.rel (!%p2134_p4) target bundleno = 943 (0x3af), region = 60 }
 0x378   : > { %v1964_v24 = vpop.eup %1963 }
 0x379   : > { %1217 = vst.msk [vmem:[%s2442_s30 + $0x60] sm:$0xff] %vm1204_vm3, %v1964_v24 }
 0x37a   : > { %s2581_s19 = smov (!%p1227_p8, %s1226_s19), 13 }
 0x37b   : > { %s1558_s25 = sshll.u32 %s2581_s19, 7 }
 0x37c   : > { %p1561_p9 = scmp.eq.s32.totalorder %s1558_s25, 0 }
 0x37d   : > { %1965 = sdivrem.u32 (!%p1561_p9), %s2581_s19, 13 }
 0x37e   : > { %1235 = sbr.rel (%p1561_p9) target bundleno = 943 (0x3af), region = 64 }
 0x386   : > { %s2487_s17 = spop.drf %1965 }
 0x387   : > { %p1562_p10 = scmp.le.s32.totalorder %s2487_s17, 0 }
 0x388   : > { %s2574_s12 = smov (!%p1562_p10), %s2481_s24  ;;  %s2575_s20 = smov (!%p1562_p10), %s2442_s30 }
 0x389   : > { %1440 = sbr.rel (%p1562_p10) target bundleno = 918 (0x396), region = 140  ;;  %s2496_s26 = smov (!%p1562_p10), 0  }
 0x38a   : > { %s2498_s27 = smov (!%p1562_p10), 0  }
 0x38e LB: >> { %v1324_v25 = vld [vmem:[%s2031_s20] sm:$0xff]  ;;  %v1326_v26 = vld [vmem:[%s2031_s20 + $0x8] sm:$0xff]  ;;  %v1328_v27 = vld [vmem:[%s2031_s20 + $0x10] sm:$0xff]  ;;  %s1350_s28 = sadd.s32 1, %s2035_s26  ;;  %s1318_s27 = sadd.s32 1, %s2039_s27   ;;  %s2039_s27 = sphi %s2498_s27, %s1318_s27   ;;  %s2035_s26 = sphi %s2496_s26, %s2576_s26   ;;  %s2031_s20 = sphi %s2575_s20, %s1355_s20   ;;  %s2027_s12 = sphi %s2574_s12, %s1356_s12  }
 0x38f   : >> { %1325 = vst [vmem:[%s2027_s12] sm:$0xff] %v1324_v25  ;;  %1327 = vst [vmem:[%s2027_s12 + $0x8] sm:$0xff] %v1326_v26  ;;  %v1330_v28 = vld [vmem:[%s2031_s20 + $0x18] sm:$0xff]  ;;  %v1332_v29 = vld [vmem:[%s2031_s20 + $0x20] sm:$0xff]  ;;  %p1351_p11 = scmp.ge.s32.totalorder %s1350_s28, %s2487_s17  ;;  %p1317_p12 = scmp.ge.s32.totalorder %s1318_s27, %s2487_s17 }
 0x390   : >> { %1329 = vst [vmem:[%s2027_s12 + $0x10] sm:$0xff] %v1328_v27  ;;  %v1334_v30 = vld [vmem:[%s2031_s20 + $0x28] sm:$0xff]  ;;  %1331 = vst [vmem:[%s2027_s12 + $0x18] sm:$0xff] %v1330_v28  ;;  %v1336_v31 = vld [vmem:[%s2031_s20 + $0x30] sm:$0xff] }
 0x391   : >> { %1333 = vst [vmem:[%s2027_s12 + $0x20] sm:$0xff] %v1332_v29  ;;  %1335 = vst [vmem:[%s2027_s12 + $0x28] sm:$0xff] %v1334_v30  ;;  %v1338_v32 = vld [vmem:[%s2031_s20 + $0x38] sm:$0xff]  ;;  %v1340_v33 = vld [vmem:[%s2031_s20 + $0x40] sm:$0xff]  ;;  %s2583_s28 = smov (%p1351_p11, %s1350_s28), 0  ;;  %1320 = sbr.rel (!%p1317_p12) target bundleno = 910 (0x38e), region = 146 }
 0x392   : >> { %1337 = vst [vmem:[%s2027_s12 + $0x30] sm:$0xff] %v1336_v31  ;;  %1339 = vst [vmem:[%s2027_s12 + $0x38] sm:$0xff] %v1338_v32  ;;  %v1342_v34 = vld [vmem:[%s2031_s20 + $0x48] sm:$0xff]  ;;  %v1344_v35 = vld [vmem:[%s2031_s20 + $0x50] sm:$0xff]  ;;  %s1353_s29 = smul.u32 104, %s2583_s28  ;;  %s2576_s26 = smov %s2583_s28 }
 0x393   : >> { %1341 = vst [vmem:[%s2027_s12 + $0x40] sm:$0xff] %v1340_v33  ;;  %v1346_v36 = vld [vmem:[%s2031_s20 + $0x58] sm:$0xff]  ;;  %1343 = vst [vmem:[%s2027_s12 + $0x48] sm:$0xff] %v1342_v34  ;;  %v1348_v37 = vld [vmem:[%s2031_s20 + $0x60] sm:$0xff] }
 0x394   : >> { %1345 = vst [vmem:[%s2027_s12 + $0x50] sm:$0xff] %v1344_v35  ;;  %1347 = vst [vmem:[%s2027_s12 + $0x58] sm:$0xff] %v1346_v36  ;;  %s1355_s20 = scalar_lea.vmem %s2442_s30, %s1353_s29 [#allocation2]  }
 0x395   : >> { %1349 = vst [vmem:[%s2027_s12 + $0x60] sm:$0xff] %v1348_v37  ;;  %s1356_s12 = scalar_lea.vmem %s2481_s24, %s1353_s29  }
 0x396 PF: > { %1967 = sdivrem.u32 %s2581_s19, 13 }
 0x397   : > { %s1563_s11 = smul.u32 104, %s2487_s17 }
 0x399   : > { %s1361_s14 = scalar_lea.vmem %s2442_s30, %s1563_s11 [#allocation2]   ;;  %s1363_s15 = scalar_lea.vmem %s2481_s24, %s1563_s11  }
 0x39f   : > { %s1968_s18 = spop.drf %1967 }
 0x3a0   : > { %p1565_p13 = scmp.le.s32.totalorder %s1968_s18, 0 }
 0x3a1   : > { %s2041_s21 = smov (!%p1565_p13), %s1363_s15   ;;  %s2045_s22 = smov (!%p1565_p13), %s1361_s14  }
 0x3a2   : > { %1454 = sbr.rel (%p1565_p13) target bundleno = 943 (0x3af), region = 151  ;;  %s2049_s23 = smov (!%p1565_p13), 0  }
 0x3a3   : > { %s2053_s25 = smov (!%p1565_p13), 0  }
 0x3a7 LB: >> { %v1373_v38 = vld [vmem:[%s2047_s22] sm:$0xff]  ;;  %s1375_s12 = sadd.s32 1, %s2051_s23  ;;  %s1367_s25 = sadd.s32 1, %s2055_s25   ;;  %s2055_s25 = sphi %s2053_s25, %s1367_s25   ;;  %s2051_s23 = sphi %s2049_s23, %s2050_s23   ;;  %s2047_s22 = sphi %s2045_s22, %s1380_s22   ;;  %s2043_s21 = sphi %s2041_s21, %s1381_s21  }
 0x3a8   : >> { %1374 = vst [vmem:[%s2043_s21] sm:$0xff] %v1373_v38  ;;  %p1376_p0 = scmp.ge.s32.totalorder %s1375_s12, %s1968_s18  ;;  %p1366_p1 = scmp.ge.s32.totalorder %s1367_s25, %s1968_s18 }
 0x3aa   : >> { %s2585_s12 = smov (%p1376_p0, %s1375_s12), 0  ;;  %1369 = sbr.rel (!%p1366_p1) target bundleno = 935 (0x3a7), region = 157 }
 0x3ab   : >> { %s1566_s30 = sshll.u32 %s2585_s12, 3  ;;  %s2050_s23 = smov %s2585_s12  }
 0x3ac   : >> { %s1380_s22 = scalar_lea.vmem %s1361_s14, %s1566_s30 [#allocation2]   ;;  %s1381_s21 = scalar_lea.vmem %s1363_s15, %s1566_s30  }
 0x3af PF: > { %p16_p2 = scmp.ge.s32.totalorder %s2124_s13, 4   ;;  %s2577_s30 = smov %s2019_s10 }
 0x3b0   : > { %s2578_s10 = smov %s2132_s16  ;;  %s2579_s11 = smov %s2124_s13 }
 0x3b1   :  { %18 = sbr.rel (!%p16_p2) target bundleno = 2 (0x2), region = 168 }

</bundles_post_ra>
